<compile_context>
chip_gen: v7x
topology: tpu7x:2x2x1
jax: 0.10.0
libtpu: 0.0.40
codegen_flags: <defaults>
</compile_context>

<pallas_src>
import jax
import jax.numpy as jnp
from jax.experimental import pallas as pl
from jax.experimental.pallas import tpu as pltpu

KERNEL = 8                   # conv kernel size (all layers)
DILATIONS = (1, 2, 4, 8)
C_IN = 8                     # cnn_0 input channels
C_HID = 32                   # hidden / output channels of every layer
BN_EPS = 1e-5
KC_MAX = KERNEL * C_HID      # 256: padded im2col contraction depth


# ---------------------------------------------------------------------------
# Pallas kernel
# ---------------------------------------------------------------------------
def _dilated_conv_block(act, block_b, l_in, dilation, w2d, bias, scale, shift):
    """Conv1d(dilation) + bias + ReLU + BatchNorm(eval) on a batch block.

    act   : (C_in, block_b * l_in)  channels-first, batch elements stacked on lanes
    w2d   : (C_HID, KERNEL * C_in)  bf16, columns ordered k-major / c_in-minor
    bias/scale/shift : (C_HID, 1)   f32
    returns (C_HID, block_b * l_out) f32
    """
    l_out = l_in - dilation * (KERNEL - 1)
    act_bf = act.astype(jnp.bfloat16)
    # Transposed im2col: rows k-major/c_in-minor, columns b-major/l-minor.
    taps = []
    for k in range(KERNEL):
        cols = [act_bf[:, b * l_in + k * dilation: b * l_in + k * dilation + l_out]
                for b in range(block_b)]
        taps.append(cols[0] if block_b == 1 else jnp.concatenate(cols, axis=1))
    patches = jnp.concatenate(taps, axis=0)           # (KERNEL*C_in, block_b*l_out)
    acc = jnp.dot(w2d, patches, preferred_element_type=jnp.float32)   # one MXU matmul
    acc = jnp.maximum(acc + bias, 0.0)                # conv bias + F.relu   (f32)
    return acc * scale + shift                        # BatchNorm1d eval, fused
    # F.dropout(training=False) is the identity -> nothing to do.


def _fgcnn_kernel(x_ref, w_ref, bss_ref, out_ref):
    block_b, _, t = x_ref.shape
    # Stack the block's batch elements along lanes: (C_IN, block_b * T), bf16.
    if block_b == 1:
        act = x_ref[0]
    else:
        act = jnp.concatenate([x_ref[b] for b in range(block_b)], axis=1)

    l = t
    for i, d in enumerate(DILATIONS):
        w2d = w_ref[i]                                # (C_HID, 256) bf16
        if i == 0:
            w2d = w2d[:, : KERNEL * C_IN]             # layer 0: only 64 valid cols
        bss = bss_ref[i]                              # (C_HID, 3) f32
        act = _dilated_conv_block(act, block_b, l, d, w2d,
                                  bss[:, 0:1], bss[:, 1:2], bss[:, 2:3])
        l -= d * (KERNEL - 1)

    # act is already channel-major per batch element -> store (C_HID, l_out) slabs.
    for b in range(block_b):
        out_ref[b] = act[:, b * l: (b + 1) * l]


# ---------------------------------------------------------------------------
# Wrapper
# ---------------------------------------------------------------------------
def _pack_params(params):
    """Pack the 16 per-layer tensors into 2 slabs for the kernel."""
    w_rows, bss_rows = [], []
    for i in range(4):
        w = params[f"w{i}"]                           # torch layout (C_out, C_in, K)
        c_in = w.shape[1]
        # (co, ci, k) -> (co, k, ci) -> (co, K*c_in), zero-padded to 256 columns.
        w2d = jnp.transpose(w, (0, 2, 1)).reshape(C_HID, KERNEL * c_in)
        w_rows.append(jnp.pad(w2d, ((0, 0), (0, KC_MAX - KERNEL * c_in))))
        scale = params[f"gamma{i}"] / jnp.sqrt(params[f"var{i}"] + BN_EPS)
        shift = params[f"beta{i}"] - params[f"mean{i}"] * scale
        bss_rows.append(jnp.stack([params[f"b{i}"], scale, shift], axis=1))  # (32, 3)
    w_packed = jnp.stack(w_rows, axis=0).astype(jnp.bfloat16)      # (4, 32, 256) bf16
    bss_packed = jnp.stack(bss_rows, axis=0).astype(jnp.float32)   # (4, 32, 3)   f32
    return w_packed, bss_packed


def feature_generator_cnn(x_tbc, params):
    """x_tbc: (T, B, 8) like the PyTorch module's input. Returns (B, 32*L_out) f32."""
    t, bsz, c_in = x_tbc.shape
    assert c_in == C_IN
    l_out = t - sum(d * (KERNEL - 1) for d in DILATIONS)
    assert l_out >= 1, "sequence too short for the 4 dilated convs"

    # The module's own `input.permute(1, 2, 0)`: (T, B, C) -> (B, C, T);
    # fuse the bf16 cast into it so the kernel DMAs half the bytes.
    x_bct = jnp.transpose(x_tbc, (1, 2, 0)).astype(jnp.bfloat16)
    w_packed, bss_packed = _pack_params(params)

    # Batch-coarsened grid: >= 2 parallel steps keeps both v7x TensorCores busy
    # while amortizing the ~0.35us per-grid-step pipeline overhead.
    block_b = bsz // 2 if (bsz > 1 and bsz % 2 == 0) else 1
    n_blocks = bsz // block_b

    # TODO(synk): for very long T add a T-blocking grid axis with a
    # sum(d*(K-1)) = 105-row halo (v7x has only 64 MiB VMEM); at T~121 the whole
    # sequence fits trivially per step.
    out = pl.pallas_call(
        _fgcnn_kernel,
        out_shape=jax.ShapeDtypeStruct((bsz, C_HID, l_out), jnp.float32),
        grid_spec=pltpu.PrefetchScalarGridSpec(
            num_scalar_prefetch=0,
            grid=(n_blocks,),
            in_specs=[
                pl.BlockSpec((block_b, C_IN, t), lambda i: (i, 0, 0)),      # x
                pl.BlockSpec((4, C_HID, KC_MAX), lambda i: (0, 0, 0)),      # weights
                pl.BlockSpec((4, C_HID, 3), lambda i: (0, 0, 0)),           # b/scale/shift
            ],
            out_specs=pl.BlockSpec((block_b, C_HID, l_out), lambda i: (i, 0, 0)),
        ),
        compiler_params=pltpu.CompilerParams(
            dimension_semantics=("parallel",)),
    )(x_bct, w_packed, bss_packed)

    # PyTorch's `features.view(B, C*L)` on a contiguous (B, C, L) tensor is a
    # plain row-major flatten -> free reshape (no transpose, no extra HBM pass).
    return out.reshape(bsz, C_HID * l_out)


# ---------------------------------------------------------------------------
# Deterministic synthetic parameters (PyTorch layout: w (C_out, C_in, K))
# ---------------------------------------------------------------------------
def init_params(key):
    params = {}
    c_ins = (C_IN, C_HID, C_HID, C_HID)
    for i, c_in in enumerate(c_ins):
        key, kw, kb, kg, kbe, km, kv = jax.random.split(key, 7)
        bound = 1.0 / ((c_in * KERNEL) ** 0.5)
        params[f"w{i}"] = jax.random.uniform(
            kw, (C_HID, c_in, KERNEL), jnp.float32, -bound, bound)
        params[f"b{i}"] = jax.random.uniform(kb, (C_HID,), jnp.float32, -bound, bound)
        params[f"gamma{i}"] = 1.0 + 0.1 * jax.random.normal(kg, (C_HID,), jnp.float32)
        params[f"beta{i}"] = 0.1 * jax.random.normal(kbe, (C_HID,), jnp.float32)
        params[f"mean{i}"] = 0.1 * jax.random.normal(km, (C_HID,), jnp.float32)
        params[f"var{i}"] = jnp.abs(jax.random.normal(kv, (C_HID,), jnp.float32)) + 0.5
    return params


# ---------------------------------------------------------------------------
# Pure-JAX f32 reference (for correctness check)
# ---------------------------------------------------------------------------
def reference(x_tbc, params):
    x = jnp.transpose(x_tbc, (1, 2, 0)).astype(jnp.float32)       # (B, C, T)
    for i, d in enumerate(DILATIONS):
        w = params[f"w{i}"]                                        # (32, c_in, 8)
        l_out = x.shape[-1] - d * (KERNEL - 1)
        acc = jnp.zeros((x.shape[0], C_HID, l_out), jnp.float32)
        for k in range(KERNEL):
            acc = acc + jnp.einsum("bcl,oc->bol", x[:, :, k * d:k * d + l_out], w[:, :, k])
        acc = jnp.maximum(acc + params[f"b{i}"][None, :, None], 0.0)
        scale = params[f"gamma{i}"] / jnp.sqrt(params[f"var{i}"] + BN_EPS)
        shift = params[f"beta{i}"] - params[f"mean{i}"] * scale
        x = acc * scale[None, :, None] + shift[None, :, None]
    return x.reshape(x.shape[0], -1)


if __name__ == "__main__":
    key = jax.random.PRNGKey(0)
    kx, kp = jax.random.split(key)
    params = init_params(kp)
    fgcnn = jax.jit(feature_generator_cnn)

    # seq=121, batch=2, channels=8  ->  L_out = 121 - (7+14+28+56) = 16
    t, bsz = 121, 2
    x = jax.random.normal(kx, (t, bsz, C_IN), jnp.float32)
    out = fgcnn(x, params)
    jax.block_until_ready(out)
    assert out.shape == (bsz, C_HID * 16), out.shape
    ref = reference(x, params)
    assert jnp.allclose(out, ref, rtol=3e-2, atol=3e-2), \
        float(jnp.max(jnp.abs(out - ref)))

    # Also exercise the batch-coarsened path (block_b = 2, two parallel steps).
    x4 = jax.random.normal(kx, (t, 4, C_IN), jnp.float32)
    out4 = fgcnn(x4, params)
    jax.block_until_ready(out4)
    ref4 = reference(x4, params)
    assert out4.shape == (4, C_HID * 16), out4.shape
    assert jnp.allclose(out4, ref4, rtol=3e-2, atol=3e-2), \
        float(jnp.max(jnp.abs(out4 - ref4)))

    print("KERNEL_OK")
</pallas_src>

<mosaic_0001>
module attributes {stable_mosaic.version = 11 : i64} {
  func.func @_fgcnn_kernel(%arg0: i32, %arg1: memref<1x8x121xbf16, #tpu.memory_space<vmem>>, %arg2: memref<4x32x256xbf16, #tpu.memory_space<vmem>>, %arg3: memref<4x32x3xf32, #tpu.memory_space<vmem>>, %arg4: memref<1x32x16xf32, #tpu.memory_space<vmem>>) attributes {dimension_semantics = [#tpu.dimension_semantics<parallel>], iteration_bounds = array<i64: 2>, scalar_prefetch = 0 : i64, scratch_operands = 0 : i64, tpu.core_type = #tpu.core_type<tc>, window_params = [{transform_indices = @transform_0, window_bounds = array<i64: 1, 8, 121>}, {pipeline_mode = #tpu.pipeline_mode<synchronous>, transform_indices = @transform_1, window_bounds = array<i64: 4, 32, 256>}, {pipeline_mode = #tpu.pipeline_mode<synchronous>, transform_indices = @transform_2, window_bounds = array<i64: 4, 32, 3>}, {transform_indices = @transform_3, window_bounds = array<i64: 1, 32, 16>}]} {
    %c0 = arith.constant 0 : index
    %c0_0 = arith.constant 0 : index
    %c0_1 = arith.constant 0 : index
    %0 = vector.load %arg1[%c0, %c0_0, %c0_1] : memref<1x8x121xbf16, #tpu.memory_space<vmem>>, vector<1x8x121xbf16>
    %1 = vector.shape_cast %0 : vector<1x8x121xbf16> to vector<8x121xbf16>
    %c0_2 = arith.constant 0 : index
    %c0_3 = arith.constant 0 : index
    %c0_4 = arith.constant 0 : index
    %2 = vector.load %arg2[%c0_2, %c0_3, %c0_4] : memref<4x32x256xbf16, #tpu.memory_space<vmem>>, vector<1x32x256xbf16>
    %3 = vector.shape_cast %2 : vector<1x32x256xbf16> to vector<32x256xbf16>
    %4 = vector.extract_strided_slice %3 {offsets = [0, 0], sizes = [32, 64], strides = [1, 1]} : vector<32x256xbf16> to vector<32x64xbf16>
    %c0_5 = arith.constant 0 : index
    %c0_6 = arith.constant 0 : index
    %c0_7 = arith.constant 0 : index
    %5 = vector.load %arg3[%c0_5, %c0_6, %c0_7] : memref<4x32x3xf32, #tpu.memory_space<vmem>>, vector<1x32x3xf32>
    %6 = vector.shape_cast %5 : vector<1x32x3xf32> to vector<32x3xf32>
    %7 = vector.extract_strided_slice %6 {offsets = [0, 0], sizes = [32, 1], strides = [1, 1]} : vector<32x3xf32> to vector<32x1xf32>
    %8 = vector.extract_strided_slice %6 {offsets = [0, 1], sizes = [32, 1], strides = [1, 1]} : vector<32x3xf32> to vector<32x1xf32>
    %9 = vector.extract_strided_slice %6 {offsets = [0, 2], sizes = [32, 1], strides = [1, 1]} : vector<32x3xf32> to vector<32x1xf32>
    %10 = vector.extract_strided_slice %1 {offsets = [0, 0], sizes = [8, 114], strides = [1, 1]} : vector<8x121xbf16> to vector<8x114xbf16>
    %11 = vector.extract_strided_slice %1 {offsets = [0, 1], sizes = [8, 114], strides = [1, 1]} : vector<8x121xbf16> to vector<8x114xbf16>
    %12 = vector.extract_strided_slice %1 {offsets = [0, 2], sizes = [8, 114], strides = [1, 1]} : vector<8x121xbf16> to vector<8x114xbf16>
    %13 = vector.extract_strided_slice %1 {offsets = [0, 3], sizes = [8, 114], strides = [1, 1]} : vector<8x121xbf16> to vector<8x114xbf16>
    %14 = vector.extract_strided_slice %1 {offsets = [0, 4], sizes = [8, 114], strides = [1, 1]} : vector<8x121xbf16> to vector<8x114xbf16>
    %15 = vector.extract_strided_slice %1 {offsets = [0, 5], sizes = [8, 114], strides = [1, 1]} : vector<8x121xbf16> to vector<8x114xbf16>
    %16 = vector.extract_strided_slice %1 {offsets = [0, 6], sizes = [8, 114], strides = [1, 1]} : vector<8x121xbf16> to vector<8x114xbf16>
    %17 = vector.extract_strided_slice %1 {offsets = [0, 7], sizes = [8, 114], strides = [1, 1]} : vector<8x121xbf16> to vector<8x114xbf16>
    %18 = tpu.concatenate %10, %11, %12, %13, %14, %15, %16, %17 in 0 : vector<8x114xbf16>, vector<8x114xbf16>, vector<8x114xbf16>, vector<8x114xbf16>, vector<8x114xbf16>, vector<8x114xbf16>, vector<8x114xbf16>, vector<8x114xbf16> -> vector<64x114xbf16>
    %cst = arith.constant dense<0.000000e+00> : vector<32x114xf32>
    %19 = tpu.matmul %4, %18, %cst {dimension_numbers = #tpu.dot_dimension_numbers<[1], [0], [0], [1], [0, 0, 1, 1], [], []>} : vector<32x64xbf16>, vector<64x114xbf16>, vector<32x114xf32> -> vector<32x114xf32>
    %20 = vector.broadcast %7 : vector<32x1xf32> to vector<32x114xf32>
    %21 = arith.addf %19, %20 : vector<32x114xf32>
    %cst_8 = arith.constant 0.000000e+00 : f32
    %22 = vector.broadcast %cst_8 : f32 to vector<32x114xf32>
    %23 = arith.maximumf %21, %22 : vector<32x114xf32>
    %24 = vector.broadcast %8 : vector<32x1xf32> to vector<32x114xf32>
    %25 = arith.mulf %23, %24 : vector<32x114xf32>
    %26 = vector.broadcast %9 : vector<32x1xf32> to vector<32x114xf32>
    %27 = arith.addf %25, %26 : vector<32x114xf32>
    %c1 = arith.constant 1 : index
    %c0_9 = arith.constant 0 : index
    %c0_10 = arith.constant 0 : index
    %28 = vector.load %arg2[%c1, %c0_9, %c0_10] : memref<4x32x256xbf16, #tpu.memory_space<vmem>>, vector<1x32x256xbf16>
    %29 = vector.shape_cast %28 : vector<1x32x256xbf16> to vector<32x256xbf16>
    %c1_11 = arith.constant 1 : index
    %c0_12 = arith.constant 0 : index
    %c0_13 = arith.constant 0 : index
    %30 = vector.load %arg3[%c1_11, %c0_12, %c0_13] : memref<4x32x3xf32, #tpu.memory_space<vmem>>, vector<1x32x3xf32>
    %31 = vector.shape_cast %30 : vector<1x32x3xf32> to vector<32x3xf32>
    %32 = vector.extract_strided_slice %31 {offsets = [0, 0], sizes = [32, 1], strides = [1, 1]} : vector<32x3xf32> to vector<32x1xf32>
    %33 = vector.extract_strided_slice %31 {offsets = [0, 1], sizes = [32, 1], strides = [1, 1]} : vector<32x3xf32> to vector<32x1xf32>
    %34 = vector.extract_strided_slice %31 {offsets = [0, 2], sizes = [32, 1], strides = [1, 1]} : vector<32x3xf32> to vector<32x1xf32>
    %35 = arith.truncf %27 : vector<32x114xf32> to vector<32x114xbf16>
    %36 = vector.extract_strided_slice %35 {offsets = [0, 0], sizes = [32, 100], strides = [1, 1]} : vector<32x114xbf16> to vector<32x100xbf16>
    %37 = vector.extract_strided_slice %35 {offsets = [0, 2], sizes = [32, 100], strides = [1, 1]} : vector<32x114xbf16> to vector<32x100xbf16>
    %38 = vector.extract_strided_slice %35 {offsets = [0, 4], sizes = [32, 100], strides = [1, 1]} : vector<32x114xbf16> to vector<32x100xbf16>
    %39 = vector.extract_strided_slice %35 {offsets = [0, 6], sizes = [32, 100], strides = [1, 1]} : vector<32x114xbf16> to vector<32x100xbf16>
    %40 = vector.extract_strided_slice %35 {offsets = [0, 8], sizes = [32, 100], strides = [1, 1]} : vector<32x114xbf16> to vector<32x100xbf16>
    %41 = vector.extract_strided_slice %35 {offsets = [0, 10], sizes = [32, 100], strides = [1, 1]} : vector<32x114xbf16> to vector<32x100xbf16>
    %42 = vector.extract_strided_slice %35 {offsets = [0, 12], sizes = [32, 100], strides = [1, 1]} : vector<32x114xbf16> to vector<32x100xbf16>
    %43 = vector.extract_strided_slice %35 {offsets = [0, 14], sizes = [32, 100], strides = [1, 1]} : vector<32x114xbf16> to vector<32x100xbf16>
    %44 = tpu.concatenate %36, %37, %38, %39, %40, %41, %42, %43 in 0 : vector<32x100xbf16>, vector<32x100xbf16>, vector<32x100xbf16>, vector<32x100xbf16>, vector<32x100xbf16>, vector<32x100xbf16>, vector<32x100xbf16>, vector<32x100xbf16> -> vector<256x100xbf16>
    %cst_14 = arith.constant dense<0.000000e+00> : vector<32x100xf32>
    %45 = tpu.matmul %29, %44, %cst_14 {dimension_numbers = #tpu.dot_dimension_numbers<[1], [0], [0], [1], [0, 0, 1, 1], [], []>} : vector<32x256xbf16>, vector<256x100xbf16>, vector<32x100xf32> -> vector<32x100xf32>
    %46 = vector.broadcast %32 : vector<32x1xf32> to vector<32x100xf32>
    %47 = arith.addf %45, %46 : vector<32x100xf32>
    %cst_15 = arith.constant 0.000000e+00 : f32
    %48 = vector.broadcast %cst_15 : f32 to vector<32x100xf32>
    %49 = arith.maximumf %47, %48 : vector<32x100xf32>
    %50 = vector.broadcast %33 : vector<32x1xf32> to vector<32x100xf32>
    %51 = arith.mulf %49, %50 : vector<32x100xf32>
    %52 = vector.broadcast %34 : vector<32x1xf32> to vector<32x100xf32>
    %53 = arith.addf %51, %52 : vector<32x100xf32>
    %c2 = arith.constant 2 : index
    %c0_16 = arith.constant 0 : index
    %c0_17 = arith.constant 0 : index
    %54 = vector.load %arg2[%c2, %c0_16, %c0_17] : memref<4x32x256xbf16, #tpu.memory_space<vmem>>, vector<1x32x256xbf16>
    %55 = vector.shape_cast %54 : vector<1x32x256xbf16> to vector<32x256xbf16>
    %c2_18 = arith.constant 2 : index
    %c0_19 = arith.constant 0 : index
    %c0_20 = arith.constant 0 : index
    %56 = vector.load %arg3[%c2_18, %c0_19, %c0_20] : memref<4x32x3xf32, #tpu.memory_space<vmem>>, vector<1x32x3xf32>
    %57 = vector.shape_cast %56 : vector<1x32x3xf32> to vector<32x3xf32>
    %58 = vector.extract_strided_slice %57 {offsets = [0, 0], sizes = [32, 1], strides = [1, 1]} : vector<32x3xf32> to vector<32x1xf32>
    %59 = vector.extract_strided_slice %57 {offsets = [0, 1], sizes = [32, 1], strides = [1, 1]} : vector<32x3xf32> to vector<32x1xf32>
    %60 = vector.extract_strided_slice %57 {offsets = [0, 2], sizes = [32, 1], strides = [1, 1]} : vector<32x3xf32> to vector<32x1xf32>
    %61 = arith.truncf %53 : vector<32x100xf32> to vector<32x100xbf16>
    %62 = vector.extract_strided_slice %61 {offsets = [0, 0], sizes = [32, 72], strides = [1, 1]} : vector<32x100xbf16> to vector<32x72xbf16>
    %63 = vector.extract_strided_slice %61 {offsets = [0, 4], sizes = [32, 72], strides = [1, 1]} : vector<32x100xbf16> to vector<32x72xbf16>
    %64 = vector.extract_strided_slice %61 {offsets = [0, 8], sizes = [32, 72], strides = [1, 1]} : vector<32x100xbf16> to vector<32x72xbf16>
    %65 = vector.extract_strided_slice %61 {offsets = [0, 12], sizes = [32, 72], strides = [1, 1]} : vector<32x100xbf16> to vector<32x72xbf16>
    %66 = vector.extract_strided_slice %61 {offsets = [0, 16], sizes = [32, 72], strides = [1, 1]} : vector<32x100xbf16> to vector<32x72xbf16>
    %67 = vector.extract_strided_slice %61 {offsets = [0, 20], sizes = [32, 72], strides = [1, 1]} : vector<32x100xbf16> to vector<32x72xbf16>
    %68 = vector.extract_strided_slice %61 {offsets = [0, 24], sizes = [32, 72], strides = [1, 1]} : vector<32x100xbf16> to vector<32x72xbf16>
    %69 = vector.extract_strided_slice %61 {offsets = [0, 28], sizes = [32, 72], strides = [1, 1]} : vector<32x100xbf16> to vector<32x72xbf16>
    %70 = tpu.concatenate %62, %63, %64, %65, %66, %67, %68, %69 in 0 : vector<32x72xbf16>, vector<32x72xbf16>, vector<32x72xbf16>, vector<32x72xbf16>, vector<32x72xbf16>, vector<32x72xbf16>, vector<32x72xbf16>, vector<32x72xbf16> -> vector<256x72xbf16>
    %cst_21 = arith.constant dense<0.000000e+00> : vector<32x72xf32>
    %71 = tpu.matmul %55, %70, %cst_21 {dimension_numbers = #tpu.dot_dimension_numbers<[1], [0], [0], [1], [0, 0, 1, 1], [], []>} : vector<32x256xbf16>, vector<256x72xbf16>, vector<32x72xf32> -> vector<32x72xf32>
    %72 = vector.broadcast %58 : vector<32x1xf32> to vector<32x72xf32>
    %73 = arith.addf %71, %72 : vector<32x72xf32>
    %cst_22 = arith.constant 0.000000e+00 : f32
    %74 = vector.broadcast %cst_22 : f32 to vector<32x72xf32>
    %75 = arith.maximumf %73, %74 : vector<32x72xf32>
    %76 = vector.broadcast %59 : vector<32x1xf32> to vector<32x72xf32>
    %77 = arith.mulf %75, %76 : vector<32x72xf32>
    %78 = vector.broadcast %60 : vector<32x1xf32> to vector<32x72xf32>
    %79 = arith.addf %77, %78 : vector<32x72xf32>
    %c3 = arith.constant 3 : index
    %c0_23 = arith.constant 0 : index
    %c0_24 = arith.constant 0 : index
    %80 = vector.load %arg2[%c3, %c0_23, %c0_24] : memref<4x32x256xbf16, #tpu.memory_space<vmem>>, vector<1x32x256xbf16>
    %81 = vector.shape_cast %80 : vector<1x32x256xbf16> to vector<32x256xbf16>
    %c3_25 = arith.constant 3 : index
    %c0_26 = arith.constant 0 : index
    %c0_27 = arith.constant 0 : index
    %82 = vector.load %arg3[%c3_25, %c0_26, %c0_27] : memref<4x32x3xf32, #tpu.memory_space<vmem>>, vector<1x32x3xf32>
    %83 = vector.shape_cast %82 : vector<1x32x3xf32> to vector<32x3xf32>
    %84 = vector.extract_strided_slice %83 {offsets = [0, 0], sizes = [32, 1], strides = [1, 1]} : vector<32x3xf32> to vector<32x1xf32>
    %85 = vector.extract_strided_slice %83 {offsets = [0, 1], sizes = [32, 1], strides = [1, 1]} : vector<32x3xf32> to vector<32x1xf32>
    %86 = vector.extract_strided_slice %83 {offsets = [0, 2], sizes = [32, 1], strides = [1, 1]} : vector<32x3xf32> to vector<32x1xf32>
    %87 = arith.truncf %79 : vector<32x72xf32> to vector<32x72xbf16>
    %88 = vector.extract_strided_slice %87 {offsets = [0, 0], sizes = [32, 16], strides = [1, 1]} : vector<32x72xbf16> to vector<32x16xbf16>
    %89 = vector.extract_strided_slice %87 {offsets = [0, 8], sizes = [32, 16], strides = [1, 1]} : vector<32x72xbf16> to vector<32x16xbf16>
    %90 = vector.extract_strided_slice %87 {offsets = [0, 16], sizes = [32, 16], strides = [1, 1]} : vector<32x72xbf16> to vector<32x16xbf16>
    %91 = vector.extract_strided_slice %87 {offsets = [0, 24], sizes = [32, 16], strides = [1, 1]} : vector<32x72xbf16> to vector<32x16xbf16>
    %92 = vector.extract_strided_slice %87 {offsets = [0, 32], sizes = [32, 16], strides = [1, 1]} : vector<32x72xbf16> to vector<32x16xbf16>
    %93 = vector.extract_strided_slice %87 {offsets = [0, 40], sizes = [32, 16], strides = [1, 1]} : vector<32x72xbf16> to vector<32x16xbf16>
    %94 = vector.extract_strided_slice %87 {offsets = [0, 48], sizes = [32, 16], strides = [1, 1]} : vector<32x72xbf16> to vector<32x16xbf16>
    %95 = vector.extract_strided_slice %87 {offsets = [0, 56], sizes = [32, 16], strides = [1, 1]} : vector<32x72xbf16> to vector<32x16xbf16>
    %96 = tpu.concatenate %88, %89, %90, %91, %92, %93, %94, %95 in 0 : vector<32x16xbf16>, vector<32x16xbf16>, vector<32x16xbf16>, vector<32x16xbf16>, vector<32x16xbf16>, vector<32x16xbf16>, vector<32x16xbf16>, vector<32x16xbf16> -> vector<256x16xbf16>
    %cst_28 = arith.constant dense<0.000000e+00> : vector<32x16xf32>
    %97 = tpu.matmul %81, %96, %cst_28 {dimension_numbers = #tpu.dot_dimension_numbers<[1], [0], [0], [1], [0, 0, 1, 1], [], []>} : vector<32x256xbf16>, vector<256x16xbf16>, vector<32x16xf32> -> vector<32x16xf32>
    %98 = vector.broadcast %84 : vector<32x1xf32> to vector<32x16xf32>
    %99 = arith.addf %97, %98 : vector<32x16xf32>
    %cst_29 = arith.constant 0.000000e+00 : f32
    %100 = vector.broadcast %cst_29 : f32 to vector<32x16xf32>
    %101 = arith.maximumf %99, %100 : vector<32x16xf32>
    %102 = vector.broadcast %85 : vector<32x1xf32> to vector<32x16xf32>
    %103 = arith.mulf %101, %102 : vector<32x16xf32>
    %104 = vector.broadcast %86 : vector<32x1xf32> to vector<32x16xf32>
    %105 = arith.addf %103, %104 : vector<32x16xf32>
    %c0_30 = arith.constant 0 : index
    %c0_31 = arith.constant 0 : index
    %c0_32 = arith.constant 0 : index
    %106 = vector.load %arg4[%c0_30, %c0_31, %c0_32] : memref<1x32x16xf32, #tpu.memory_space<vmem>>, vector<1x32x16xf32>
    %107 = vector.shape_cast %106 : vector<1x32x16xf32> to vector<32x16xf32>
    %108 = vector.shape_cast %105 : vector<32x16xf32> to vector<1x32x16xf32>
    tpu.vector_store %arg4[%c0_30, %c0_31, %c0_32], %108 {strides = array<i32>} : memref<1x32x16xf32, #tpu.memory_space<vmem>>, vector<1x32x16xf32>,
    return
  }
  func.func @transform_0(%arg0: i32) -> (i32, i32, i32) {
    %c0_i32 = arith.constant 0 : i32
    %c0_i32_0 = arith.constant 0 : i32
    %c0_i32_1 = arith.constant 0 : i32
    return %arg0, %c0_i32, %c0_i32_0 : i32, i32, i32
  }
  func.func @transform_1(%arg0: i32) -> (i32, i32, i32) {
    %c0_i32 = arith.constant 0 : i32
    %c0_i32_0 = arith.constant 0 : i32
    %c0_i32_1 = arith.constant 0 : i32
    %c0_i32_2 = arith.constant 0 : i32
    return %c0_i32, %c0_i32_0, %c0_i32_1 : i32, i32, i32
  }
  func.func @transform_2(%arg0: i32) -> (i32, i32, i32) {
    %c0_i32 = arith.constant 0 : i32
    %c0_i32_0 = arith.constant 0 : i32
    %c0_i32_1 = arith.constant 0 : i32
    %c0_i32_2 = arith.constant 0 : i32
    return %c0_i32, %c0_i32_0, %c0_i32_1 : i32, i32, i32
  }
  func.func @transform_3(%arg0: i32) -> (i32, i32, i32) {
    %c0_i32 = arith.constant 0 : i32
    %c0_i32_0 = arith.constant 0 : i32
    %c0_i32_1 = arith.constant 0 : i32
    return %arg0, %c0_i32, %c0_i32_0 : i32, i32, i32
  }
}

</mosaic_0001>

<bundles_post_ra>
// kernel: feature_generator_cnn.1
= control target key start
LH: loop header
LB: loop body
LE: loop exit
PB: predicated region body
PF: predicated region fallthrough
CT: control target
= control target key end

     0   :  { %s1254_s12 = smov 0   ;;  %s1434_s0 = inlined_call_operand.vmem [shape: bf16[2,8,121], index: 0, kind: input, shape index: {}]   ;;  %s1435_s1 = inlined_call_operand.vmem [shape: bf16[4,32,256], index: 1, kind: input, shape index: {}]   ;;  %s1436_s2 = inlined_call_operand.vmem [shape: f32[4,32,3], index: 2, kind: input, shape index: {}]   ;;  %s1437_s3 = inlined_call_operand.vmem [shape: f32[2,32,16], index: 3, kind: output, shape index: {}]  }
   0x1 LB: > { %s969_s13 = sadd.s32 4294967295, %s1210_s12   ;;  %p973_p0 = scmp.ge.s32.totalorder %s1210_s12, 1  ;;  %s1210_s12 = sphi %s1254_s12, %s13_s12  }
   0x2   : > { %p136_p1 = scmp.lt.s32.totalorder %s1210_s12, 3 }
   0x4   : > { %p137_p2 = pnand %p973_p0, %p136_p1 }
   0x5   : > { %p159_p3 = scmp.lt.s32.totalorder (!%p137_p2), %s969_s13, 1  ;;  %s1212_s18 = smov (!%p137_p2), 127   ;;  %v1184_v2 = vld [vmem:[%s1435_s1] ss:$8 sps:$4 sm:$0xff] (!%p137_p2)   ;;  %vm242_vm0 = vcmask (!%p137_p2), 523264   ;;  %v1216_v3 = vmov (!%p137_p2), 0  }
   0x6   : > { %140 = sbr.rel (%p137_p2) target bundleno = 1513 (0x5e9), region = 32  ;;  %s1213_s19 = smov (!%p137_p2), 125   ;;  %1119 = vmatprep.mubr.msk.bf16.mxu0 (!%p137_p2), %vm242_vm0, %v1184_v2  ;;  %1153 = vset.pattern.permute.xlu1 (!%p137_p2), %v1216_v3  ;;  %v174_v4 = vld [vmem:[%s1436_s2] sm:$0xff] (!%p137_p2)  ;;  %v176_v5 = vld [vmem:[%s1436_s2 + $0x10] sm:$0xff] (!%p137_p2)  ;;  %v175_v6 = vld [vmem:[%s1436_s2 + $0x8] sm:$0xff] (!%p137_p2)  ;;  %v1220_v8 = vmov (!%p137_p2), 1  }
   0x7   : > { %s1214_s22 = smov (!%p137_p2), 126   ;;  %s1215_s23 = smov (!%p137_p2), 124   ;;  %1154 = vset.pattern.permute.xlu0 (!%p137_p2), %v1216_v3  ;;  %v177_v7 = vld [vmem:[%s1436_s2 + $0x18] sm:$0xff] (!%p137_p2)  ;;  %v1221_v9 = vmov (!%p137_p2), 2   ;;  %vm195_vm1 = vcmask (!%p137_p2), 1043456   ;;  %v987_v57 = vld [vmem:[%s1436_s2 + $0x28] sm:$0xff] (!%p137_p2) }
   0x8   : > { %s1217_s24 = smov (!%p137_p2), 123   ;;  %s1218_s25 = smov (!%p137_p2), 122   ;;  %v1185_v21 = vld [vmem:[%s1435_s1 + $0x10] ss:$8 sps:$4 sm:$0xff] (!%p137_p2)   ;;  %v1188_v56 = vld [vmem:[%s1435_s1 + $0x24] ss:$8 sps:$4 sm:$0xff] (!%p137_p2)  }
   0x9   : > { %s1219_s28 = smov (!%p137_p2), 121   ;;  %s1222_s10 = smov (!%p137_p2), 120   ;;  %470 = vmatprep.mubr.bf16.mxu1 (!%p137_p2), %v1188_v56  ;;  %v986_v58 = vld [vmem:[%s1436_s2 + $0x20] sm:$0xff] (!%p137_p2)  ;;  %v988_v59 = vld [vmem:[%s1436_s2 + $0x30] sm:$0xff] (!%p137_p2)  ;;  %v989_v60 = vld [vmem:[%s1436_s2 + $0x38] sm:$0xff] (!%p137_p2)  ;;  %vm909_vm2 = vcmask (!%p137_p2), 130048  }
   0xa   : > { %s1223_s11 = smov (!%p137_p2), 118   ;;  %s1226_s6 = smov (!%p137_p2), 112  }
   0xb   : > { %s1227_s7 = smov (!%p137_p2), 108   ;;  %s1228_s8 = smov (!%p137_p2), 104  }
   0xc   : > { %s1229_s9 = smov (!%p137_p2), 100   ;;  %s1230_s29 = smov (!%p137_p2), 96  }
   0xd   : > { %s1439_s13 = smov (!%p159_p3, %s969_s13), 1  ;;  %s1231_s30 = smov 88  }
   0xe   : > { %s974_s14 = sshll.u32 %s1439_s13, 2  ;;  %s1232_s4 = smov 80  }
   0xf   : > { %s162_s17 = scalar_lea.vmem %s1434_s0, %s974_s14  ;;  %s1224_s14 = smov 116  }
  0x10   : > { %v169_v0 = vld [vmem:[%s162_s17] sm:$0xf]  ;;  %s1225_s17 = smov 114   ;;  %s1233_s5 = smov 72  }
  0x11   : > { %v977_v1 = vcombine.low %v169_v0, %v169_v0 }
  0x13   : > { %181 = vrot.lane.b32.xlu0 %v977_v1, %s1212_s18  ;;  %185 = vrot.lane.b32.xlu1 %v977_v1, %s1213_s19 }
  0x17   : > { %183 = vrot.lane.b32.xlu0 %v977_v1, %s1214_s22  ;;  %187 = vrot.lane.b32.xlu1 %v977_v1, %s1215_s23 }
  0x1b   : > { %189 = vrot.lane.b32.xlu0 %v977_v1, %s1217_s24  ;;  %191 = vrot.lane.b32.xlu1 %v977_v1, %s1218_s25  ;;  %s1020_s24 = sshll.u32 %s1439_s13, 5 }
  0x1f   : > { %193 = vrot.lane.b32.xlu0 %v977_v1, %s1219_s28  ;;  %214 = vperm.xlu1 %1153, %v174_v4  }
  0x23   : > { %224 = vperm.xlu1 %1153, %v176_v5   ;;  %219 = vperm.xlu0 %1154, %v175_v6  }
  0x27   : > { %229 = vperm.xlu1 %1153, %v177_v7   ;;  %1155 = vset.pattern.permute.xlu0 %v1220_v8 }
  0x28   : > { %303 = vperm.xlu0 %1155, %v174_v4  }
  0x2b   : > { %1156 = vset.pattern.permute.xlu1 %v1220_v8 }
  0x2c   : > { %307 = vperm.xlu1 %1156, %v175_v6   ;;  %1158 = vset.pattern.permute.xlu0 %v1221_v9 }
  0x2d   : > { %327 = vperm.xlu0 %1158, %v175_v6  }
  0x30   : > { %1157 = vset.pattern.permute.xlu1 %v1221_v9 }
  0x31   : > { %323 = vperm.xlu1 %1157, %v174_v4   ;;  %331 = vperm.xlu0 %1158, %v176_v5  }
  0x35   : > { %1159 = vset.pattern.permute.xlu1 %v1220_v8  ;;  %1161 = vset.pattern.permute.xlu0 %v1216_v3 }
  0x36   : > { %311 = vperm.xlu1 %1159, %v176_v5  }
  0x3a   : > { %315 = vperm.xlu1 %1159, %v177_v7  }
  0x3e   : > { %1160 = vset.pattern.permute.xlu1 %v1221_v9 }
  0x3f   : > { %335 = vperm.xlu1 %1160, %v177_v7  }
  0x43   : > { %1162 = vset.pattern.permute.xlu1 %v1216_v3 }
  0x85   : > { %v182_v10 = vpop.permute.xlu0 %181  ;;  %v186_v11 = vpop.permute.xlu1 %185 }
  0x86   : > { %v198_v12 = vsel %vm195_vm1, %v169_v0, %v182_v10 }
  0x87   : > { %1111 = vmatprep.subr.bf16.mxu0 %v198_v12 }
  0x88   : > { %1112 = vmatpush3.bf16.msra.mxu0 %v198_v12 }
  0x89   : > { %v184_v13 = vpop.permute.xlu0 %183  ;;  %v188_v14 = vpop.permute.xlu1 %187 }
  0x8a   : > { %v202_v15 = vsel %vm195_vm1, %v184_v13, %v186_v11 }
  0x8b   : > { %1113 = vmatprep.subr.bf16.mxu0 %v202_v15 }
  0x8c   : > { %1114 = vmatpush3.bf16.msra.mxu0 %v202_v15  ;;  %v1189_v15 = vld [vmem:[%s1435_s1 + $0x34] ss:$8 sps:$4 sm:$0xff]  }
  0x8d   : > { %v190_v16 = vpop.permute.xlu0 %189  ;;  %v192_v18 = vpop.permute.xlu1 %191 }
  0x8e   : > { %v206_v17 = vsel %vm195_vm1, %v188_v14, %v190_v16  ;;  %v1186_v14 = vld [vmem:[%s1435_s1 + $0x20] ss:$8 sps:$4 sm:$0xff]   ;;  %v1191_v16 = vld [vmem:[%s1435_s1 + $0x30] ss:$8 sps:$4 sm:$0xff]  }
  0x8f   : > { %1115 = vmatprep.subr.bf16.mxu0 %v206_v17 }
  0x90   : > { %1116 = vmatpush3.bf16.msra.mxu0 %v206_v17 }
  0x91   : > { %v194_v19 = vpop.permute.xlu0 %193 }
  0x92   : > { %v210_v20 = vsel %vm195_vm1, %v192_v18, %v194_v19 }
  0x93   : > { %1117 = vmatprep.subr.bf16.mxu0 %v210_v20 }
  0x94   : > { %1118 = vmatpush3.bf16.msra.mxu0 %v210_v20 }
  0x97   : > { %1120 = vmatmul.mubr.msk.bf16.vlgmr.msra.gmra.mrb[0].mxu0 %vm242_vm0, %v1185_v21 }
  0x9e   : > { %v215_v22 = vpop.permute.xlu1 %214 }
  0xa2   : > { %v225_v23 = vpop.permute.xlu1 %224  ;;  %v220_v26 = vpop.permute.xlu0 %219 }
  0xa6   : > { %v230_v24 = vpop.permute.xlu1 %229 }
  0xa7   : > { %v304_v28 = vpop.permute.xlu0 %303 }
  0xab   : > { %v308_v25 = vpop.permute.xlu1 %307 }
  0xac   : > { %v328_v30 = vpop.permute.xlu0 %327 }
  0xb0   : > { %v324_v27 = vpop.permute.xlu1 %323  ;;  %v332_v46 = vpop.permute.xlu0 %331 }
  0xb5   : > { %v312_v29 = vpop.permute.xlu1 %311 }
  0xb9   : > { %v316_v32 = vpop.permute.xlu1 %315 }
  0xbe   : > { %v336_v47 = vpop.permute.xlu1 %335 }
 0x16a   : > { %v1121_v31 = vpop.f32.mrb[0].mxu0 }
 0x16b   : > { %v292_v33 = vadd.f32 %v1121_v31, %v225_v23  ;;  %v283_v34 = vpop.f32.mrb[1].mxu0 }
 0x16c   : > { %v284_v35 = vadd.f32 %v283_v34, %v215_v22  ;;  %v1122_v36 = vpop.f32.mrb[2].mxu0 }
 0x16d   : > { %v300_v37 = vmax.f32 %v292_v33, 0.0  ;;  %v295_v38 = vadd.f32 %v1122_v36, %v230_v24  ;;  %v286_v39 = vpop.f32.mrb[3].mxu0 }
 0x16e   : > { %v298_v40 = vmax.f32 %v284_v35, 0.0  ;;  %v287_v41 = vadd.f32 %v286_v39, %v220_v26 }
 0x16f   : > { %v301_v42 = vmax.f32 %v295_v38, 0.0  ;;  %v320_v43 = vmul.f32 %v312_v29, %v300_v37 }
 0x170   : > { %v318_v44 = vmul.f32 %v304_v28, %v298_v40  ;;  %v299_v45 = vmax.f32 %v287_v41, 0.0 }
 0x171   : > { %v321_v48 = vmul.f32 %v316_v32, %v301_v42  ;;  %v340_v50 = vadd.f32 %v332_v46, %v320_v43 }
 0x172   : > { %v319_v49 = vmul.f32 %v308_v25, %v299_v45  ;;  %v338_v52 = vadd.f32 %v324_v27, %v318_v44 }
 0x173   : > { %v341_v51 = vadd.f32 %v336_v47, %v321_v48 }
 0x174   : > { %v339_v53 = vadd.f32 %v328_v30, %v319_v49 }
 0x175   : > { %v353_v54 = vpack.c.bf16 %v341_v51, %v340_v50 }
 0x176   : > { %v352_v55 = vpack.c.bf16 %v339_v53, %v338_v52 }
 0x177   : > { %376 = vrot.lane.b32.xlu1 %v353_v54, %s1222_s10 }
 0x178   : > { %374 = vrot.lane.b32.xlu0 %v352_v55, %s1222_s10 }
 0x17b   : > { %356 = vrot.lane.b32.xlu1 %v352_v55, %s1214_s22 }
 0x17c   : > { %380 = vrot.lane.b32.xlu0 %v352_v55, %s1223_s11 }
 0x17f   : > { %358 = vrot.lane.b32.xlu1 %v353_v54, %s1214_s22 }
 0x180   : > { %382 = vrot.lane.b32.xlu0 %v353_v54, %s1223_s11 }
 0x183   : > { %362 = vrot.lane.b32.xlu1 %v352_v55, %s1215_s23 }
 0x184   : > { %386 = vrot.lane.b32.xlu0 %v352_v55, %s1224_s14 }
 0x187   : > { %364 = vrot.lane.b32.xlu1 %v353_v54, %s1215_s23 }
 0x188   : > { %388 = vrot.lane.b32.xlu0 %v353_v54, %s1224_s14 }
 0x18b   : > { %368 = vrot.lane.b32.xlu1 %v352_v55, %s1218_s25 }
 0x18c   : > { %392 = vrot.lane.b32.xlu0 %v352_v55, %s1225_s17 }
 0x18f   : > { %370 = vrot.lane.b32.xlu1 %v353_v54, %s1218_s25  ;;  %s167_s25 = scalar_lea.vmem %s1437_s3, %s1020_s24 }
 0x190   : > { %394 = vrot.lane.b32.xlu0 %v353_v54, %s1225_s17 }
 0x193   : > { %405 = vperm.xlu1 %1162, %v987_v57  }
 0x194   : > { %400 = vperm.xlu0 %1161, %v986_v58  }
 0x197   : > { %410 = vperm.xlu1 %1162, %v988_v59  }
 0x198   : > { %415 = vperm.xlu0 %1161, %v989_v60  }
 0x19b   : > { %1163 = vset.pattern.permute.xlu1 %v1220_v8 }
 0x19c   : > { %1164 = vset.pattern.permute.xlu0 %v1220_v8  ;;  %492 = vperm.xlu1 %1163, %v986_v58  }
 0x19d   : > { %496 = vperm.xlu0 %1164, %v987_v57  }
 0x1a0   : > { %1165 = vset.pattern.permute.xlu1 %v1221_v9 }
 0x1a1   : > { %500 = vperm.xlu0 %1164, %v988_v59   ;;  %512 = vperm.xlu1 %1165, %v986_v58  }
 0x1a5   : > { %1167 = vset.pattern.permute.xlu0 %v1221_v9  ;;  %516 = vperm.xlu1 %1165, %v987_v57  }
 0x1a6   : > { %520 = vperm.xlu0 %1167, %v988_v59   ;;  %v1194_v59 = vld [vmem:[%s1435_s1 + $0x44] ss:$8 sps:$4 sm:$0xff]  }
 0x1a7   : > { %659 = vmatprep.mubr.bf16.mxu0 %v1194_v59 }
 0x1a9   : > { %1166 = vset.pattern.permute.xlu1 %v1220_v8 }
 0x1aa   : > { %1170 = vset.pattern.permute.xlu0 %v1216_v3  ;;  %504 = vperm.xlu1 %1166, %v989_v60  }
 0x1ae   : > { %1168 = vset.pattern.permute.xlu1 %v1221_v9 }
 0x1af   : > { %524 = vperm.xlu1 %1168, %v989_v60   ;;  %v998_v60 = vld [vmem:[%s1436_s2 + $0x40] sm:$0xff] }
 0x1b3   : > { %1169 = vset.pattern.permute.xlu1 %v1216_v3 }
 0x1e9   : > { %v377_v61 = vpop.permute.xlu1 %376 }
 0x1ea   : > { %v375_v62 = vpop.permute.xlu0 %374 }
 0x1eb   : > { %1027 = vmatprep.subr.bf16.mxu1 %v375_v62  ;;  %v999_v62 = vld [vmem:[%s1436_s2 + $0x48] sm:$0xff] }
 0x1ec   : > { %1028 = vmatpush3.bf16.msra.mxu1 %v352_v55 }
 0x1ed   : > { %v357_v63 = vpop.permute.xlu1 %356  ;;  %1029 = vmatprep.subr.bf16.mxu1 %v377_v61  ;;  %v1000_v61 = vld [vmem:[%s1436_s2 + $0x50] sm:$0xff] }
 0x1ee   : > { %v381_v0 = vpop.permute.xlu0 %380 }
 0x1f0   : > { %1030 = vmatpush3.bf16.msra.mxu1 %v353_v54 }
 0x1f1   : > { %v359_v1 = vpop.permute.xlu1 %358  ;;  %1031 = vmatprep.subr.bf16.mxu1 %v381_v0 }
 0x1f2   : > { %v383_v2 = vpop.permute.xlu0 %382 }
 0x1f4   : > { %1032 = vmatpush3.bf16.msra.mxu1 %v357_v63  ;;  %v1001_v63 = vld [vmem:[%s1436_s2 + $0x58] sm:$0xff] }
 0x1f5   : > { %v363_v4 = vpop.permute.xlu1 %362  ;;  %1033 = vmatprep.subr.bf16.mxu1 %v383_v2 }
 0x1f6   : > { %v387_v5 = vpop.permute.xlu0 %386 }
 0x1f8   : > { %1034 = vmatpush3.bf16.msra.mxu1 %v359_v1 }
 0x1f9   : > { %1035 = vmatprep.subr.bf16.mxu1 %v387_v5  ;;  %v365_v7 = vpop.permute.xlu1 %364 }
 0x1fa   : > { %v389_v6 = vpop.permute.xlu0 %388 }
 0x1fc   : > { %1036 = vmatpush3.bf16.msra.mxu1 %v363_v4 }
 0x1fd   : > { %1037 = vmatprep.subr.bf16.mxu1 %v389_v6  ;;  %v369_v11 = vpop.permute.xlu1 %368 }
 0x1fe   : > { %v393_v10 = vpop.permute.xlu0 %392 }
 0x200   : > { %1038 = vmatpush3.bf16.msra.mxu1 %v365_v7 }
 0x201   : > { %1039 = vmatprep.subr.bf16.mxu1 %v393_v10  ;;  %v371_v13 = vpop.permute.xlu1 %370 }
 0x202   : > { %v395_v12 = vpop.permute.xlu0 %394 }
 0x204   : > { %1040 = vmatpush3.bf16.msra.mxu1 %v369_v11 }
 0x205   : > { %1041 = vmatprep.subr.bf16.mxu1 %v395_v12 }
 0x208   : > { %1042 = vmatpush3.bf16.msra.mxu1 %v371_v13 }
 0x20b   : > { %471 = vmatmul.mubr.bf16.vlgmr.msra.gmra.mrb[0].mxu1 %v1186_v14 }
 0x20c   : > { %478 = vmatprep.mubr.bf16.mxu1 %v1189_v15 }
 0x212   : > { %v406_v17 = vpop.permute.xlu1 %405 }
 0x213   : > { %479 = vmatmul.mubr.bf16.gmra.mrb[4].mxu1 %v1191_v16  ;;  %v401_v20 = vpop.permute.xlu0 %400  ;;  %v1192_v16 = vld [vmem:[%s1435_s1 + $0x40] ss:$8 sps:$4 sm:$0xff]  }
 0x216   : > { %v411_v18 = vpop.permute.xlu1 %410 }
 0x217   : > { %v416_v24 = vpop.permute.xlu0 %415 }
 0x21b   : > { %v493_v19 = vpop.permute.xlu1 %492 }
 0x21c   : > { %v497_v33 = vpop.permute.xlu0 %496 }
 0x220   : > { %v513_v22 = vpop.permute.xlu1 %512  ;;  %v501_v47 = vpop.permute.xlu0 %500 }
 0x224   : > { %v517_v32 = vpop.permute.xlu1 %516 }
 0x225   : > { %v521_v53 = vpop.permute.xlu0 %520 }
 0x229   : > { %v505_v42 = vpop.permute.xlu1 %504 }
 0x22e   : > { %v525_v54 = vpop.permute.xlu1 %524 }
 0x2de   : > { %v1043_v21 = vpop.f32.mrb[0].mxu1 }
 0x2df   : > { %v1044_v23 = vpop.f32.mrb[1].mxu1 }
 0x2e0   : > { %v1045_v25 = vadd.f32 %v1044_v23, %v1043_v21  ;;  %v1046_v26 = vpop.f32.mrb[2].mxu1 }
 0x2e1   : > { %v1047_v27 = vpop.f32.mrb[3].mxu1 }
 0x2e2   : > { %v473_v28 = vadd.f32 %v1045_v25, %v401_v20  ;;  %v1048_v29 = vadd.f32 %v1047_v27, %v1046_v26 }
 0x2e4   : > { %v487_v30 = vmax.f32 %v473_v28, 0.0  ;;  %v476_v31 = vadd.f32 %v1048_v29, %v406_v17  ;;  %v1195_v17 = vld [vmem:[%s1435_s1 + $0x54] ss:$8 sps:$4 sm:$0xff]  }
 0x2e6   : > { %v507_v34 = vmul.f32 %v493_v19, %v487_v30  ;;  %v488_v35 = vmax.f32 %v476_v31, 0.0  ;;  %v1049_v36 = vpop.f32.mrb[4].mxu1 }
 0x2e7   : > { %v1050_v37 = vpop.f32.mrb[5].mxu1 }
 0x2e8   : > { %v508_v38 = vmul.f32 %v497_v33, %v488_v35  ;;  %v1051_v39 = vadd.f32 %v1050_v37, %v1049_v36  ;;  %v1052_v40 = vpop.f32.mrb[6].mxu1  ;;  %v527_v43 = vadd.f32 %v513_v22, %v507_v34 }
 0x2e9   : > { %v1053_v41 = vpop.f32.mrb[7].mxu1 }
 0x2ea   : > { %v528_v44 = vadd.f32 %v517_v32, %v508_v38  ;;  %v481_v45 = vadd.f32 %v1051_v39, %v411_v18  ;;  %v1054_v46 = vadd.f32 %v1053_v41, %v1052_v40  ;;  %v1197_v18 = vld [vmem:[%s1435_s1 + $0x50] ss:$8 sps:$4 sm:$0xff]  }
 0x2ec   : > { %v541_v48 = vpack.c.bf16 %v528_v44, %v527_v43  ;;  %v489_v49 = vmax.f32 %v481_v45, 0.0  ;;  %v484_v50 = vadd.f32 %v1054_v46, %v416_v24 }
 0x2ee   : > { %v509_v51 = vmul.f32 %v501_v47, %v489_v49  ;;  %v490_v52 = vmax.f32 %v484_v50, 0.0  ;;  %563 = vrot.lane.b32.xlu1 %v541_v48, %s1226_s6 }
 0x2f0   : > { %v510_v55 = vmul.f32 %v505_v42, %v490_v52  ;;  %v529_v56 = vadd.f32 %v521_v53, %v509_v51 }
 0x2f2   : > { %v530_v57 = vadd.f32 %v525_v54, %v510_v55  ;;  %569 = vrot.lane.b32.xlu1 %v541_v48, %s1227_s7 }
 0x2f4   : > { %v542_v58 = vpack.c.bf16 %v530_v57, %v529_v56 }
 0x2f6   : > { %571 = vrot.lane.b32.xlu1 %v542_v58, %s1227_s7  ;;  %565 = vrot.lane.b32.xlu0 %v542_v58, %s1226_s6 }
 0x2fa   : > { %575 = vrot.lane.b32.xlu1 %v541_v48, %s1228_s8  ;;  %545 = vrot.lane.b32.xlu0 %v541_v48, %s1215_s23 }
 0x2fe   : > { %577 = vrot.lane.b32.xlu1 %v542_v58, %s1228_s8  ;;  %547 = vrot.lane.b32.xlu0 %v542_v58, %s1215_s23 }
 0x302   : > { %581 = vrot.lane.b32.xlu1 %v541_v48, %s1229_s9  ;;  %551 = vrot.lane.b32.xlu0 %v541_v48, %s1222_s10 }
 0x306   : > { %583 = vrot.lane.b32.xlu1 %v542_v58, %s1229_s9  ;;  %553 = vrot.lane.b32.xlu0 %v542_v58, %s1222_s10 }
 0x30a   : > { %557 = vrot.lane.b32.xlu0 %v541_v48, %s1224_s14  ;;  %589 = vperm.xlu1 %1169, %v998_v60  }
 0x30e   : > { %559 = vrot.lane.b32.xlu0 %v542_v58, %s1224_s14  ;;  %599 = vperm.xlu1 %1169, %v1000_v61  }
 0x312   : > { %594 = vperm.xlu0 %1170, %v999_v62   ;;  %604 = vperm.xlu1 %1169, %v1001_v63  }
 0x316   : > { %1171 = vset.pattern.permute.xlu0 %v1220_v8  ;;  %1172 = vset.pattern.permute.xlu1 %v1220_v8 }
 0x317   : > { %681 = vperm.xlu0 %1171, %v998_v60   ;;  %685 = vperm.xlu1 %1172, %v999_v62  }
 0x31b   : > { %1174 = vset.pattern.permute.xlu0 %v1221_v9  ;;  %1173 = vset.pattern.permute.xlu1 %v1221_v9 }
 0x31c   : > { %705 = vperm.xlu0 %1174, %v999_v62   ;;  %701 = vperm.xlu1 %1173, %v998_v60   ;;  %v1010_v62 = vld [vmem:[%s1436_s2 + $0x60] sm:$0xff] }
 0x320   : > { %709 = vperm.xlu0 %1174, %v1000_v61   ;;  %1175 = vset.pattern.permute.xlu1 %v1220_v8 }
 0x321   : > { %689 = vperm.xlu1 %1175, %v1000_v61   ;;  %v1200_v61 = vld [vmem:[%s1435_s1 + $0x64] ss:$8 sps:$4 sm:$0xff]  }
 0x322   : > { %848 = vmatprep.mubr.bf16.mxu1 %v1200_v61 }
 0x324   : > { %1177 = vset.pattern.permute.xlu0 %v1216_v3 }
 0x325   : > { %693 = vperm.xlu1 %1175, %v1001_v63  }
 0x329   : > { %1176 = vset.pattern.permute.xlu1 %v1221_v9 }
 0x32a   : > { %713 = vperm.xlu1 %1176, %v1001_v63   ;;  %v1011_v63 = vld [vmem:[%s1436_s2 + $0x68] sm:$0xff] }
 0x32e   : > { %1178 = vset.pattern.permute.xlu1 %v1216_v3 }
 0x360   : > { %v564_v0 = vpop.permute.xlu1 %563 }
 0x361   : > { %1055 = vmatprep.subr.bf16.mxu0 %v564_v0  ;;  %v1013_v0 = vld [vmem:[%s1436_s2 + $0x78] sm:$0xff] }
 0x362   : > { %1056 = vmatpush3.bf16.msra.mxu0 %v541_v48 }
 0x364   : > { %v570_v1 = vpop.permute.xlu1 %569 }
 0x368   : > { %v572_v2 = vpop.permute.xlu1 %571  ;;  %v566_v4 = vpop.permute.xlu0 %565 }
 0x369   : > { %1057 = vmatprep.subr.bf16.mxu0 %v566_v4 }
 0x36a   : > { %1058 = vmatpush3.bf16.msra.mxu0 %v542_v58 }
 0x36b   : > { %1059 = vmatprep.subr.bf16.mxu0 %v570_v1  ;;  %v1012_v1 = vld [vmem:[%s1436_s2 + $0x70] sm:$0xff] }
 0x36c   : > { %v576_v5 = vpop.permute.xlu1 %575  ;;  %v546_v6 = vpop.permute.xlu0 %545 }
 0x36e   : > { %1060 = vmatpush3.bf16.msra.mxu0 %v546_v6 }
 0x36f   : > { %1061 = vmatprep.subr.bf16.mxu0 %v572_v2 }
 0x370   : > { %v548_v7 = vpop.permute.xlu0 %547  ;;  %v578_v10 = vpop.permute.xlu1 %577 }
 0x372   : > { %1062 = vmatpush3.bf16.msra.mxu0 %v548_v7 }
 0x373   : > { %1063 = vmatprep.subr.bf16.mxu0 %v576_v5 }
 0x374   : > { %v552_v11 = vpop.permute.xlu0 %551  ;;  %v582_v3 = vpop.permute.xlu1 %581 }
 0x376   : > { %1064 = vmatpush3.bf16.msra.mxu0 %v552_v11 }
 0x377   : > { %1065 = vmatprep.subr.bf16.mxu0 %v578_v10 }
 0x378   : > { %v554_v12 = vpop.permute.xlu0 %553  ;;  %v584_v14 = vpop.permute.xlu1 %583 }
 0x37a   : > { %1066 = vmatpush3.bf16.msra.mxu0 %v554_v12 }
 0x37b   : > { %1067 = vmatprep.subr.bf16.mxu0 %v582_v3 }
 0x37c   : > { %v558_v13 = vpop.permute.xlu0 %557 }
 0x37e   : > { %1068 = vmatpush3.bf16.msra.mxu0 %v558_v13 }
 0x37f   : > { %1069 = vmatprep.subr.bf16.mxu0 %v584_v14 }
 0x380   : > { %v560_v15 = vpop.permute.xlu0 %559 }
 0x382   : > { %1070 = vmatpush3.bf16.msra.mxu0 %v560_v15 }
 0x385   : > { %660 = vmatmul.mubr.bf16.vlgmr.msra.gmra.mrb[4].mxu0 %v1192_v16  ;;  %v1198_v16 = vld [vmem:[%s1435_s1 + $0x60] ss:$8 sps:$4 sm:$0xff]  }
 0x386   : > { %667 = vmatprep.mubr.bf16.mxu0 %v1195_v17  ;;  %v1201_v17 = vld [vmem:[%s1435_s1 + $0x74] ss:$8 sps:$4 sm:$0xff]  }
 0x389   : > { %v590_v19 = vpop.permute.xlu1 %589 }
 0x38d   : > { %668 = vmatmul.mubr.bf16.gmra.mrb[8].mxu0 %v1197_v18  ;;  %v600_v20 = vpop.permute.xlu1 %599  ;;  %v1203_v18 = vld [vmem:[%s1435_s1 + $0x70] ss:$8 sps:$4 sm:$0xff]  }
 0x391   : > { %v605_v21 = vpop.permute.xlu1 %604  ;;  %v595_v23 = vpop.permute.xlu0 %594 }
 0x396   : > { %v686_v22 = vpop.permute.xlu1 %685  ;;  %v682_v30 = vpop.permute.xlu0 %681 }
 0x39b   : > { %v702_v26 = vpop.permute.xlu1 %701  ;;  %v706_v40 = vpop.permute.xlu0 %705 }
 0x39f   : > { %v710_v57 = vpop.permute.xlu0 %709 }
 0x3a0   : > { %v690_v35 = vpop.permute.xlu1 %689 }
 0x3a4   : > { %v694_v49 = vpop.permute.xlu1 %693 }
 0x3a9   : > { %v714_v55 = vpop.permute.xlu1 %713 }
 0x458   : > { %v1071_v24 = vpop.f32.mrb[4].mxu0 }
 0x459   : > { %v1072_v25 = vpop.f32.mrb[5].mxu0 }
 0x45a   : > { %v1073_v27 = vadd.f32 %v1072_v25, %v1071_v24  ;;  %v1074_v28 = vpop.f32.mrb[6].mxu0 }
 0x45b   : > { %v1075_v29 = vpop.f32.mrb[7].mxu0 }
 0x45c   : > { %v662_v31 = vadd.f32 %v1073_v27, %v590_v19  ;;  %v1076_v32 = vadd.f32 %v1075_v29, %v1074_v28 }
 0x45e   : > { %v665_v33 = vadd.f32 %v1076_v32, %v595_v23  ;;  %v676_v34 = vmax.f32 %v662_v31, 0.0 }
 0x460   : > { %v677_v36 = vmax.f32 %v665_v33, 0.0  ;;  %v696_v37 = vmul.f32 %v682_v30, %v676_v34  ;;  %v1077_v38 = vpop.f32.mrb[8].mxu0 }
 0x461   : > { %v1078_v39 = vpop.f32.mrb[9].mxu0 }
 0x462   : > { %v1079_v41 = vadd.f32 %v1078_v39, %v1077_v38  ;;  %v1080_v42 = vpop.f32.mrb[10].mxu0  ;;  %v697_v43 = vmul.f32 %v686_v22, %v677_v36  ;;  %v716_v45 = vadd.f32 %v702_v26, %v696_v37 }
 0x463   : > { %v1081_v44 = vpop.f32.mrb[11].mxu0 }
 0x464   : > { %v670_v46 = vadd.f32 %v1079_v41, %v600_v20  ;;  %v1082_v47 = vadd.f32 %v1081_v44, %v1080_v42  ;;  %v717_v48 = vadd.f32 %v706_v40, %v697_v43 }
 0x466   : > { %v678_v50 = vmax.f32 %v670_v46, 0.0  ;;  %v673_v51 = vadd.f32 %v1082_v47, %v605_v21  ;;  %v730_v52 = vpack.c.bf16 %v717_v48, %v716_v45 }
 0x468   : > { %v679_v53 = vmax.f32 %v673_v51, 0.0  ;;  %v698_v54 = vmul.f32 %v690_v35, %v678_v50  ;;  %752 = vrot.lane.b32.xlu0 %v730_v52, %s1230_s29 }
 0x46a   : > { %v699_v56 = vmul.f32 %v694_v49, %v679_v53  ;;  %v718_v58 = vadd.f32 %v710_v57, %v698_v54 }
 0x46c   : > { %v719_v59 = vadd.f32 %v714_v55, %v699_v56  ;;  %758 = vrot.lane.b32.xlu0 %v730_v52, %s1231_s30 }
 0x46e   : > { %v731_v60 = vpack.c.bf16 %v719_v59, %v718_v58 }
 0x470   : > { %760 = vrot.lane.b32.xlu0 %v731_v60, %s1231_s30  ;;  %754 = vrot.lane.b32.xlu1 %v731_v60, %s1230_s29 }
 0x474   : > { %764 = vrot.lane.b32.xlu0 %v730_v52, %s1232_s4  ;;  %734 = vrot.lane.b32.xlu1 %v730_v52, %s1222_s10 }
 0x478   : > { %766 = vrot.lane.b32.xlu0 %v731_v60, %s1232_s4  ;;  %736 = vrot.lane.b32.xlu1 %v731_v60, %s1222_s10 }
 0x47c   : > { %770 = vrot.lane.b32.xlu0 %v730_v52, %s1233_s5  ;;  %740 = vrot.lane.b32.xlu1 %v730_v52, %s1226_s6 }
 0x480   : > { %772 = vrot.lane.b32.xlu0 %v731_v60, %s1233_s5  ;;  %742 = vrot.lane.b32.xlu1 %v731_v60, %s1226_s6 }
 0x484   : > { %746 = vrot.lane.b32.xlu1 %v730_v52, %s1228_s8  ;;  %778 = vperm.xlu0 %1177, %v1010_v62  }
 0x488   : > { %748 = vrot.lane.b32.xlu1 %v731_v60, %s1228_s8  ;;  %793 = vperm.xlu0 %1177, %v1013_v0  }
 0x48c   : > { %783 = vperm.xlu1 %1178, %v1011_v63   ;;  %1180 = vset.pattern.permute.xlu0 %v1220_v8 }
 0x48d   : > { %874 = vperm.xlu0 %1180, %v1011_v63  }
 0x490   : > { %788 = vperm.xlu1 %1178, %v1012_v1  }
 0x491   : > { %1181 = vset.pattern.permute.xlu0 %v1221_v9 }
 0x492   : > { %890 = vperm.xlu0 %1181, %v1010_v62  }
 0x494   : > { %1179 = vset.pattern.permute.xlu1 %v1220_v8 }
 0x495   : > { %870 = vperm.xlu1 %1179, %v1010_v62  }
 0x496   : > { %902 = vperm.xlu0 %1181, %v1013_v0  }
 0x499   : > { %878 = vperm.xlu1 %1179, %v1012_v1  }
 0x49d   : > { %882 = vperm.xlu1 %1179, %v1013_v0  }
 0x4a1   : > { %1182 = vset.pattern.permute.xlu1 %v1221_v9 }
 0x4a2   : > { %894 = vperm.xlu1 %1182, %v1011_v63  }
 0x4a6   : > { %898 = vperm.xlu1 %1182, %v1012_v1  }
 0x4da   : > { %v753_v2 = vpop.permute.xlu0 %752 }
 0x4db   : > { %1083 = vmatprep.subr.bf16.mxu1 %v753_v2 }
 0x4dc   : > { %1084 = vmatpush3.bf16.msra.mxu1 %v730_v52 }
 0x4de   : > { %v759_v4 = vpop.permute.xlu0 %758 }
 0x4e2   : > { %v755_v5 = vpop.permute.xlu1 %754  ;;  %v761_v6 = vpop.permute.xlu0 %760 }
 0x4e3   : > { %1085 = vmatprep.subr.bf16.mxu1 %v755_v5 }
 0x4e4   : > { %1086 = vmatpush3.bf16.msra.mxu1 %v731_v60 }
 0x4e5   : > { %1087 = vmatprep.subr.bf16.mxu1 %v759_v4 }
 0x4e6   : > { %v735_v8 = vpop.permute.xlu1 %734  ;;  %v765_v7 = vpop.permute.xlu0 %764 }
 0x4e8   : > { %1088 = vmatpush3.bf16.msra.mxu1 %v735_v8 }
 0x4e9   : > { %1089 = vmatprep.subr.bf16.mxu1 %v761_v6 }
 0x4ea   : > { %v737_v10 = vpop.permute.xlu1 %736  ;;  %v767_v11 = vpop.permute.xlu0 %766 }
 0x4ec   : > { %1090 = vmatpush3.bf16.msra.mxu1 %v737_v10 }
 0x4ed   : > { %1091 = vmatprep.subr.bf16.mxu1 %v765_v7 }
 0x4ee   : > { %v741_v9 = vpop.permute.xlu1 %740  ;;  %v771_v3 = vpop.permute.xlu0 %770 }
 0x4f0   : > { %1092 = vmatpush3.bf16.msra.mxu1 %v741_v9 }
 0x4f1   : > { %1093 = vmatprep.subr.bf16.mxu1 %v767_v11 }
 0x4f2   : > { %v743_v12 = vpop.permute.xlu1 %742  ;;  %v773_v14 = vpop.permute.xlu0 %772 }
 0x4f4   : > { %1094 = vmatpush3.bf16.msra.mxu1 %v743_v12 }
 0x4f5   : > { %1095 = vmatprep.subr.bf16.mxu1 %v771_v3 }
 0x4f6   : > { %v747_v13 = vpop.permute.xlu1 %746 }
 0x4f8   : > { %1096 = vmatpush3.bf16.msra.mxu1 %v747_v13 }
 0x4f9   : > { %1097 = vmatprep.subr.bf16.mxu1 %v773_v14 }
 0x4fa   : > { %v749_v15 = vpop.permute.xlu1 %748 }
 0x4fc   : > { %1098 = vmatpush3.bf16.msra.mxu1 %v749_v15 }
 0x4ff   : > { %849 = vmatmul.mubr.bf16.vlgmr.msra.gmra.mrb[8].mxu1 %v1198_v16 }
 0x500   : > { %856 = vmatprep.mubr.bf16.mxu1 %v1201_v17 }
 0x503   : > { %v779_v21 = vpop.permute.xlu0 %778 }
 0x507   : > { %857 = vmatmul.mubr.bf16.gmra.mrb[12].mxu1 %v1203_v18  ;;  %v794_v23 = vpop.permute.xlu0 %793 }
 0x50b   : > { %v784_v19 = vpop.permute.xlu1 %783 }
 0x50c   : > { %v875_v27 = vpop.permute.xlu0 %874 }
 0x50f   : > { %v789_v20 = vpop.permute.xlu1 %788 }
 0x511   : > { %v891_v36 = vpop.permute.xlu0 %890 }
 0x514   : > { %v871_v22 = vpop.permute.xlu1 %870 }
 0x515   : > { %v903_v57 = vpop.permute.xlu0 %902 }
 0x518   : > { %v879_v24 = vpop.permute.xlu1 %878 }
 0x51c   : > { %v883_v33 = vpop.permute.xlu1 %882 }
 0x521   : > { %v895_v41 = vpop.permute.xlu1 %894 }
 0x525   : > { %v899_v54 = vpop.permute.xlu1 %898 }
 0x5d2   : > { %v1099_v25 = vpop.f32.mrb[8].mxu1 }
 0x5d3   : > { %v1100_v26 = vpop.f32.mrb[9].mxu1 }
 0x5d4   : > { %v1101_v28 = vadd.f32 %v1100_v26, %v1099_v25  ;;  %v1102_v29 = vpop.f32.mrb[10].mxu1 }
 0x5d5   : > { %v1103_v30 = vpop.f32.mrb[11].mxu1 }
 0x5d6   : > { %v851_v31 = vadd.f32 %v1101_v28, %v779_v21  ;;  %v1104_v32 = vadd.f32 %v1103_v30, %v1102_v29 }
 0x5d8   : > { %v865_v34 = vmax.f32 %v851_v31, 0.0  ;;  %v854_v35 = vadd.f32 %v1104_v32, %v784_v19 }
 0x5da   : > { %v866_v37 = vmax.f32 %v854_v35, 0.0  ;;  %v1105_v38 = vpop.f32.mrb[12].mxu1  ;;  %v885_v39 = vmul.f32 %v871_v22, %v865_v34 }
 0x5db   : > { %v1106_v40 = vpop.f32.mrb[13].mxu1 }
 0x5dc   : > { %v886_v42 = vmul.f32 %v875_v27, %v866_v37  ;;  %v1107_v43 = vadd.f32 %v1106_v40, %v1105_v38  ;;  %v905_v44 = vadd.f32 %v891_v36, %v885_v39  ;;  %v1108_v45 = vpop.f32.mrb[14].mxu1 }
 0x5dd   : > { %v1109_v46 = vpop.f32.mrb[15].mxu1 }
 0x5de   : > { %v859_v47 = vadd.f32 %v1107_v43, %v789_v20  ;;  %910 = vst.msk [vmem:[%s167_s25] sm:$0xff] %vm909_vm2, %v905_v44  ;;  %v906_v48 = vadd.f32 %v895_v41, %v886_v42  ;;  %v1110_v49 = vadd.f32 %v1109_v46, %v1108_v45 }
 0x5e0   : > { %v867_v50 = vmax.f32 %v859_v47, 0.0  ;;  %911 = vst.msk [vmem:[%s167_s25 + $0x8] sm:$0xff] %vm909_vm2, %v906_v48  ;;  %v862_v51 = vadd.f32 %v1110_v49, %v794_v23 }
 0x5e2   : > { %v868_v52 = vmax.f32 %v862_v51, 0.0  ;;  %v887_v53 = vmul.f32 %v879_v24, %v867_v50 }
 0x5e4   : > { %v907_v55 = vadd.f32 %v899_v54, %v887_v53  ;;  %v888_v56 = vmul.f32 %v883_v33, %v868_v52 }
 0x5e6   : > { %912 = vst.msk [vmem:[%s167_s25 + $0x10] sm:$0xff] %vm909_vm2, %v907_v55  ;;  %v908_v58 = vadd.f32 %v903_v57, %v888_v56 }
 0x5e8   : > { %913 = vst.msk [vmem:[%s167_s25 + $0x18] sm:$0xff] %vm909_vm2, %v908_v58 }
 0x5e9 PF: > { %s13_s12 = sadd.s32 1, %s1210_s12  }
 0x5ea   : > { %p10_p4 = scmp.ge.s32.totalorder %s13_s12, 4  }
 0x5ec   :  { %12 = sbr.rel (!%p10_p4) target bundleno = 1 (0x1), region = 68 }

</bundles_post_ra>
